<compile_context>
chip_gen: v5e
topology: v5e:2x2
jax: 0.10.0
libtpu: 0.0.40
codegen_flags: <defaults>
</compile_context>

<pallas_src>
import functools

import jax
import jax.numpy as jnp
from jax.experimental import pallas as pl
from jax.experimental.pallas import tpu as pltpu


def _patch_applier_kernel(img_ref, adv_ref, out_ref, *, patch_alpha, n_patches):
    """img_ref: (1, Rt, L); adv_ref: (1, N, Rt, L); out_ref: (1, Rt, L)."""
    cur = img_ref[0]                        # (Rt, L) background tile
    for n in range(n_patches):              # small N -> unrolled at trace time
        adv = adv_ref[0, n]                 # (Rt, L) patch layer n
        if patch_alpha == 1.0:
            cur = jnp.where(adv == 0, cur, adv)
        else:
            blend = cur + patch_alpha * (adv - cur)   # == alpha*adv + (1-alpha)*cur
            cur = jnp.where(adv == 0, cur, blend)
    out_ref[0] = cur


def _vmem_params():
    """Return (double-buffered working-set budget, vmem_limit_bytes) per chip gen."""
    vmem_phys = None
    try:
        vmem_phys = int(pltpu.get_tpu_info().vmem_capacity_bytes)
    except Exception:
        vmem_phys = None
    if vmem_phys is None:
        # Unknown chip: conservative budget that fits every generation.
        return 24 << 20, 32 << 20
    if vmem_phys >= (100 << 20):
        # v5e / v6e: 128 MiB physical VMEM -> raise scoped default, use big tiles.
        return 48 << 20, 64 << 20
    # v7x: 64 MiB per TensorCore -> keep the double-buffered set well under it.
    return 28 << 20, 44 << 20


def _pick_row_tile(R, target, sublane):
    """Largest sublane-multiple row tile <= target; prefer one that divides R."""
    if R <= target or R <= sublane:
        return R
    start = (min(target, R) // sublane) * sublane
    for r in range(start, sublane - 1, -sublane):
        if R % r == 0:
            return r                        # no masked tail tile
    return max(sublane, start)              # fallback: padded/masked last tile


def _choose_tiling(M, N, B, dtype):
    """Split flat C*H*W into (rows R, lanes L), pick r_tile from the VMEM budget."""
    dtype_bytes = jnp.dtype(dtype).itemsize
    sublane = max(8, 32 // dtype_bytes)     # 8 for f32, 16 for bf16, 32 for int8
    budget, vmem_limit = _vmem_params()

    # Pad the flat axis to a multiple of 8*128 when needed so the lane dim stays
    # a multiple of 128 (unmasked vst) and rows still pipeline.
    M_pad = M if M % 128 == 0 else ((M + 1023) // 1024) * 1024

    L = 128
    for cand in (512, 256, 128):
        if M_pad % cand == 0:
            L = cand
            break
    R = M_pad // L

    # Per grid step: (N + 2) tiles in flight, each double-buffered.
    tile_elems = max(sublane * L, budget // (2 * (N + 2) * dtype_bytes))
    target_rows = max(sublane, (tile_elems // L // sublane) * sublane)
    r_tile = _pick_row_tile(R, target_rows, sublane)

    # Megacore (v7x): make sure there are >= 2 grid steps so both TCs get work.
    if B * pl.cdiv(R, r_tile) < 2 and R > sublane:
        r_tile = _pick_row_tile(R, max(sublane, -(-R // 2)), sublane)

    return M_pad, L, R, r_tile, vmem_limit


def patch_applier(img_batch, adv_batch, patch_alpha: float = 1.0):
    """img_batch: (B, C, H, W); adv_batch: (B, N, C, H, W). Returns (B, C, H, W)."""
    B, C, H, W = img_batch.shape
    _, N, _, _, _ = adv_batch.shape
    M = C * H * W

    M_pad, L, R, r_tile, vmem_limit = _choose_tiling(M, N, B, img_batch.dtype)

    img_flat = img_batch.reshape(B, M)
    adv_flat = adv_batch.reshape(B, N, M)
    if M_pad != M:
        # TODO(synk): this pad is one extra HBM copy of each tensor; only taken
        # when C*H*W is not a multiple of 128 (keeps stores lane-dense/pipelined).
        pad = M_pad - M
        img_flat = jnp.pad(img_flat, ((0, 0), (0, pad)))
        adv_flat = jnp.pad(adv_flat, ((0, 0), (0, 0), (0, pad)))

    # Free reshapes of the contiguous trailing axis -- no transpose.
    img2 = img_flat.reshape(B, R, L)
    adv2 = adv_flat.reshape(B, N, R, L)

    kernel = functools.partial(
        _patch_applier_kernel, patch_alpha=float(patch_alpha), n_patches=N
    )

    out2 = pl.pallas_call(
        kernel,
        out_shape=jax.ShapeDtypeStruct((B, R, L), img_batch.dtype),
        grid_spec=pltpu.PrefetchScalarGridSpec(
            num_scalar_prefetch=0,
            grid=(B, pl.cdiv(R, r_tile)),
            in_specs=[
                # Background image tile for this (batch, row-tile).
                pl.BlockSpec((1, r_tile, L), lambda b, r: (b, r, 0)),
                # All N patch layers for the same tile (native layout, N axis whole).
                pl.BlockSpec((1, N, r_tile, L), lambda b, r: (b, 0, r, 0)),
            ],
            out_specs=pl.BlockSpec((1, r_tile, L), lambda b, r: (b, r, 0)),
        ),
        compiler_params=pltpu.CompilerParams(
            dimension_semantics=("parallel", "parallel"),
            vmem_limit_bytes=vmem_limit,
        ),
        # Output has identical shape/dtype/layout to the background image tile
        # stack -> alias to drop one full-image HBM allocation.
        input_output_aliases={0: 0},
    )(img2, adv2)

    out_flat = out2.reshape(B, M_pad)
    if M_pad != M:
        out_flat = out_flat[:, :M]
    return out_flat.reshape(B, C, H, W)


def _reference(img_batch, adv_batch, patch_alpha=1.0):
    """Pure-JAX reference mirroring the PyTorch forward."""
    img = img_batch
    for i in range(adv_batch.shape[1]):
        adv = adv_batch[:, i]
        if patch_alpha == 1.0:
            img = jnp.where(adv == 0, img, adv)
        else:
            blend = patch_alpha * adv + (1.0 - patch_alpha) * img
            img = jnp.where(adv == 0, img, blend)
    return img


def _make_inputs(key, B, N, C, H, W):
    k_img, k_adv, k_mask = jax.random.split(key, 3)
    img_batch = jax.random.uniform(k_img, (B, C, H, W), dtype=jnp.float32)
    adv_vals = jax.random.uniform(k_adv, (B, N, C, H, W), dtype=jnp.float32) * 0.9 + 0.1
    adv_mask = jax.random.bernoulli(k_mask, 0.3, (B, N, C, H, W))
    adv_batch = jnp.where(adv_mask, adv_vals, 0.0).astype(jnp.float32)
    return img_batch, adv_batch


if __name__ == "__main__":
    key = jax.random.PRNGKey(0)
    k1, k2 = jax.random.split(key)

    # Case 1: C*H*W multiple of 128 (no padding path), both alpha modes.
    img_batch, adv_batch = _make_inputs(k1, B=2, N=3, C=4, H=16, W=16)

    out1 = jax.block_until_ready(patch_applier(img_batch, adv_batch, patch_alpha=1.0))
    ref1 = _reference(img_batch, adv_batch, patch_alpha=1.0)
    assert jnp.allclose(out1, ref1, atol=1e-5), "mismatch (alpha=1)"

    out2 = jax.block_until_ready(patch_applier(img_batch, adv_batch, patch_alpha=0.5))
    ref2 = _reference(img_batch, adv_batch, patch_alpha=0.5)
    assert jnp.allclose(out2, ref2, atol=1e-5), "mismatch (alpha=0.5)"

    # Case 2: C*H*W NOT a multiple of 128 -> exercises the pad + slice-back path.
    img_odd, adv_odd = _make_inputs(k2, B=1, N=2, C=3, H=13, W=13)

    out3 = jax.block_until_ready(patch_applier(img_odd, adv_odd, patch_alpha=0.7))
    ref3 = _reference(img_odd, adv_odd, patch_alpha=0.7)
    assert jnp.allclose(out3, ref3, atol=1e-5), "mismatch (padded, alpha=0.7)"

    print("KERNEL_OK")
</pallas_src>

<mosaic_0001>
module attributes {stable_mosaic.version = 11 : i64} {
  func.func @_patch_applier_kernel(%arg0: i32, %arg1: i32, %arg2: memref<1x2x512xf32, #tpu.memory_space<vmem>>, %arg3: memref<1x3x2x512xf32, #tpu.memory_space<vmem>>, %arg4: memref<1x2x512xf32, #tpu.memory_space<vmem>>) attributes {dimension_semantics = [#tpu.dimension_semantics<parallel>, #tpu.dimension_semantics<parallel>], iteration_bounds = array<i64: 2, 1>, scalar_prefetch = 0 : i64, scratch_operands = 0 : i64, tpu.core_type = #tpu.core_type<tc>, window_params = [{transform_indices = @transform_0, window_bounds = array<i64: 1, 2, 512>}, {transform_indices = @transform_1, window_bounds = array<i64: 1, 3, 2, 512>}, {transform_indices = @transform_2, window_bounds = array<i64: 1, 2, 512>}]} {
    %c0 = arith.constant 0 : index
    %c0_0 = arith.constant 0 : index
    %c0_1 = arith.constant 0 : index
    %0 = vector.load %arg2[%c0, %c0_0, %c0_1] : memref<1x2x512xf32, #tpu.memory_space<vmem>>, vector<1x2x512xf32>
    %1 = vector.shape_cast %0 : vector<1x2x512xf32> to vector<2x512xf32>
    %c0_2 = arith.constant 0 : index
    %c0_3 = arith.constant 0 : index
    %c0_4 = arith.constant 0 : index
    %c0_5 = arith.constant 0 : index
    %2 = vector.load %arg3[%c0_2, %c0_3, %c0_4, %c0_5] : memref<1x3x2x512xf32, #tpu.memory_space<vmem>>, vector<1x1x2x512xf32>
    %3 = vector.shape_cast %2 : vector<1x1x2x512xf32> to vector<2x512xf32>
    %cst = arith.constant 0.000000e+00 : f32
    %4 = vector.broadcast %cst : f32 to vector<2x512xf32>
    %5 = arith.cmpf oeq, %3, %4 : vector<2x512xf32>
    %6 = arith.select %5, %1, %3 : vector<2x512xi1>, vector<2x512xf32>
    %c0_6 = arith.constant 0 : index
    %c1 = arith.constant 1 : index
    %c0_7 = arith.constant 0 : index
    %c0_8 = arith.constant 0 : index
    %7 = vector.load %arg3[%c0_6, %c1, %c0_7, %c0_8] : memref<1x3x2x512xf32, #tpu.memory_space<vmem>>, vector<1x1x2x512xf32>
    %8 = vector.shape_cast %7 : vector<1x1x2x512xf32> to vector<2x512xf32>
    %cst_9 = arith.constant 0.000000e+00 : f32
    %9 = vector.broadcast %cst_9 : f32 to vector<2x512xf32>
    %10 = arith.cmpf oeq, %8, %9 : vector<2x512xf32>
    %11 = arith.select %10, %6, %8 : vector<2x512xi1>, vector<2x512xf32>
    %c0_10 = arith.constant 0 : index
    %c2 = arith.constant 2 : index
    %c0_11 = arith.constant 0 : index
    %c0_12 = arith.constant 0 : index
    %12 = vector.load %arg3[%c0_10, %c2, %c0_11, %c0_12] : memref<1x3x2x512xf32, #tpu.memory_space<vmem>>, vector<1x1x2x512xf32>
    %13 = vector.shape_cast %12 : vector<1x1x2x512xf32> to vector<2x512xf32>
    %cst_13 = arith.constant 0.000000e+00 : f32
    %14 = vector.broadcast %cst_13 : f32 to vector<2x512xf32>
    %15 = arith.cmpf oeq, %13, %14 : vector<2x512xf32>
    %16 = arith.select %15, %11, %13 : vector<2x512xi1>, vector<2x512xf32>
    %c0_14 = arith.constant 0 : index
    %c0_15 = arith.constant 0 : index
    %c0_16 = arith.constant 0 : index
    %17 = vector.load %arg4[%c0_14, %c0_15, %c0_16] : memref<1x2x512xf32, #tpu.memory_space<vmem>>, vector<1x2x512xf32>
    %18 = vector.shape_cast %17 : vector<1x2x512xf32> to vector<2x512xf32>
    %19 = vector.shape_cast %16 : vector<2x512xf32> to vector<1x2x512xf32>
    tpu.vector_store %arg4[%c0_14, %c0_15, %c0_16], %19 {strides = array<i32>} : memref<1x2x512xf32, #tpu.memory_space<vmem>>, vector<1x2x512xf32>,
    return
  }
  func.func @transform_0(%arg0: i32, %arg1: i32) -> (i32, i32, i32) {
    %c0_i32 = arith.constant 0 : i32
    %c0_i32_0 = arith.constant 0 : i32
    return %arg0, %arg1, %c0_i32 : i32, i32, i32
  }
  func.func @transform_1(%arg0: i32, %arg1: i32) -> (i32, i32, i32, i32) {
    %c0_i32 = arith.constant 0 : i32
    %c0_i32_0 = arith.constant 0 : i32
    %c0_i32_1 = arith.constant 0 : i32
    return %arg0, %c0_i32, %arg1, %c0_i32_0 : i32, i32, i32, i32
  }
  func.func @transform_2(%arg0: i32, %arg1: i32) -> (i32, i32, i32) {
    %c0_i32 = arith.constant 0 : i32
    %c0_i32_0 = arith.constant 0 : i32
    return %arg0, %arg1, %c0_i32 : i32, i32, i32
  }
}

</mosaic_0001>

<bundles_post_ra>
// kernel: tpu_custom_call.1
= control target key start
LH: loop header
LB: loop body
LE: loop exit
PB: predicated region body
PF: predicated region fallthrough
CT: control target
= control target key end

     0   :  { %7 = vsyncpa [#allocation3], 0  ;;  %s769_s0 = inlined_call_operand.hbm [shape: f32[2,2,512], index: 0, kind: input, shape index: {}, may-alias: {0,2}]   ;;  %s770_s1 = inlined_call_operand.hbm [shape: f32[2,3,2,512], index: 1, kind: input, shape index: {}]   ;;  %s771_s2 = inlined_call_operand.hbm [shape: f32[2,2,512], index: 2, kind: output, shape index: {}, may-alias: {0,2}]  }
   0x1   :  { %9 = vsyncpa [#allocation3 + $0x1], 0 }
   0x2   :  { %10 = vsyncpa [#allocation6], 0 }
   0x3   :  { %12 = vsyncpa [#allocation6 + $0x1], 0 }
   0x4   :  { %13 = vsyncpa [#allocation4], 0 }
   0x5   :  { %15 = vsyncpa [#allocation4 + $0x1], 0  ;;  %s625_s9 = smov 0   ;;  %s627_s10 = smov 0  }
   0x6   :  { %s629_s11 = smov 0   ;;  %s631_s12 = smov 0  }
   0x7   :  { %s633_s13 = smov 0   ;;  %s635_s14 = smov 0  }
   0x8 LB: > { %s368_s15 = sadd.s32 4294967295, %s606_s14   ;;  %s369_s16 = sadd.s32 4294967294, %s606_s14   ;;  %s606_s14 = sphi %s635_s14, %s21_s14   ;;  %s602_s13 = sphi %s633_s13, %s781_s13   ;;  %s598_s12 = sphi %s631_s12, %s780_s12   ;;  %s594_s11 = sphi %s629_s11, %s779_s11   ;;  %s590_s10 = sphi %s627_s10, %s778_s10   ;;  %s586_s9 = sphi %s625_s9, %s777_s9  }
   0x9   : > { %s33_s17 = sadd.s32 1, %s602_s13  ;;  %s42_s18 = sadd.s32 1, %s594_s11 }
   0xa   : > { %p35_p0 = scmp.ge.s32.totalorder %s33_s17, 2  ;;  %p49_p1 = scmp.ne.s32.totalorder %s594_s11, %s590_s10 }
   0xb   : > { %p50_p2 = scmp.eq.s32.totalorder %s606_s14, 0  ;;  %p55_p3 = scmp.ne.s32.totalorder %s590_s10, %s586_s9 }
   0xc   : > { %s783_s17 = smov (%p35_p0, %s33_s17), 0  ;;  %p56_p5 = scmp.eq.s32.totalorder %s368_s15, 0 }
   0xd   : > { %p666_p4 = por %p50_p2, %p49_p1  ;;  %s37_s20 = ssub.s32 %s602_s13, %s783_s17 }
   0xe   : > { %p109_p6 = scmp.eq.s32.totalorder %s368_s15, 1  ;;  %p40_p7 = scmp.eq.s32.totalorder %s37_s20, 0 }
   0xf   : > { %p672_p8 = por %p56_p5, %p55_p3  ;;  %p115_p10 = scmp.eq.s32.totalorder %s369_s16, 1 }
  0x10   : > { %p676_p9 = por %p109_p6, %p49_p1  ;;  %p371_p12 = scmp.ge.s32.totalorder %s606_s14, 2 }
  0x11   : > { %s681_s23 = scalar_select %p40_p7, %s594_s11, %s42_s18  }
  0x12   : > { %p683_p11 = por %p115_p10, %p55_p3  ;;  %p408_p13 = scmp.lt.s32.totalorder %s606_s14, 2 }
  0x13   : > { %s690_s25 = sand.u32 1, %s594_s11   ;;  %s386_s27 = sshll.u32 %s602_s13, 3 }
  0x14   : > { %s372_s26 = sshll.u32 %s690_s25, 3  ;;  %s146_s30 = scalar_lea.hbm %s769_s0, %s386_s27 }
  0x15   : > { %s139_s3 = scalar_lea.vmem [#allocation2], %s372_s26  ;;  %s148_s5 = sshll.u32 %s146_s30, 4  ;;  %s149_s5 = int_to_ptr.hbm [resolvable:$true] %s148_s5 }
  0x16   : > { %s150_s4 = sshll.u32 %s139_s3, 4  ;;  %p699_p0 = pnand %p408_p13, %p666_p4  ;;  %s151_s4 = int_to_ptr.vmem [resolvable:$true] %s150_s4 }
  0x17   : > { %p376_p1 = scmp.ge.s32.totalorder %s606_s14, 1  ;;  %p179_p2 = scmp.lt.s32.totalorder %s606_s14, 3 }
  0x18   : > { %s136_s7 = scalar_lea.sflag [#allocation3], %s690_s25  ;;  %s388_s8 = smul.u32 24, %s690_s25 }
  0x19   : > { %400 = dma.hbm_to_vmem [thread:$0]  (!%p699_p0), %s149_s5, 128, %s151_s4, %s136_s7  }
  0x1a   : > { %p180_p3 = pnand %p376_p1, %p179_p2  ;;  %s389_s15 = smul.u32 24, %s602_s13 }
  0x1b   : > { %s161_s26 = scalar_lea.vmem [#allocation5], %s388_s8  ;;  %s158_s28 = scalar_lea.sflag [#allocation6], %s690_s25 }
  0x1c   : > { %s168_s20 = scalar_lea.hbm %s770_s1, %s389_s15  ;;  %s171_s19 = sshll.u32 %s161_s26, 4  ;;  %s172_s19 = int_to_ptr.vmem [resolvable:$true] %s171_s19 }
  0x1d   : > { %s169_s27 = sshll.u32 %s168_s20, 4  ;;  %s608_s29 = smov 128   ;;  %s170_s27 = int_to_ptr.hbm [resolvable:$true] %s169_s27 }
  0x1e   : > { %s609_s30 = smov 8   ;;  %183 = sbr.rel (%p180_p3) target bundleno = 55 (0x37), region = 28 }
  0x1f   : > { %403 = dma.hbm_to_vmem [thread:$0]  (!%p699_p0), %s170_s27, 384, %s172_s19, %s158_s28, %s608_s29, %s608_s29, %s609_s30  }
  0x20   : > { %s717_s3 = sand.u32 (!%p180_p3), 1, %s590_s10  }
  0x21   : > { %s377_s4 = sshll.u32 (!%p180_p3), %s717_s3, 3  ;;  %s186_s5 = scalar_lea.sflag (!%p180_p3), [#allocation3], %s717_s3 }
  0x22   : > { %s189_s7 = scalar_lea.vmem (!%p180_p3), [#allocation2], %s377_s4 }
  0x23   : > { %573 = dma.done.wait (%p672_p8), %s186_s5, 128  }
  0x24   : > { %575 = vsyncadd (%p672_p8), %s186_s5, 4294967168  ;;  %s390_s25 = smul.u32 24, %s717_s3  ;;  %s196_s6 = scalar_lea.sflag [#allocation6], %s717_s3 }
  0x26   : > { %s199_s8 = scalar_lea.vmem [#allocation5], %s390_s25 }
  0x27   : > { %577 = dma.done.wait (%p672_p8), %s196_s6, 384  }
  0x28   : > { %579 = vsyncadd (%p672_p8), %s196_s6, 4294966912  ;;  %s387_s15 = sshll.u32 %s598_s12, 3  ;;  %v226_v0 = vld [vmem:[%s189_s7] sm:$0xff]  ;;  %v379_v2 = vld [vmem:[%s199_s8 + $0x8] sm:$0xff]  ;;  %s225_s26 = scalar_lea.vmem [#allocation7], %s377_s4 }
  0x29   : > { %s253_s20 = scalar_lea.hbm %s771_s2, %s387_s15  ;;  %v227_v1 = vld [vmem:[%s199_s8] sm:$0xff]  ;;  %s255_s19 = sshll.u32 %s225_s26, 4  ;;  %vm232_vm1 = vcmp.eq.f32.partialorder %v379_v2, 0.0  ;;  %v380_v3 = vld [vmem:[%s199_s8 + $0x10] sm:$0xff]  ;;  %s256_s19 = int_to_ptr.vmem [resolvable:$true] %s255_s19 }
  0x2a   : > { %s257_s27 = sshll.u32 %s253_s20, 4  ;;  %vm228_vm0 = vcmp.eq.f32.partialorder %v227_v1, 0.0  ;;  %vm236_vm2 = vcmp.eq.f32.partialorder %v380_v3, 0.0  ;;  %s240_s12 = scalar_lea.sflag [#allocation4], %s717_s3  ;;  %s258_s27 = int_to_ptr.hbm [resolvable:$true] %s257_s27 }
  0x2b   : > { %v229_v4 = vsel %vm228_vm0, %v226_v0, %v227_v1  ;;  %s534_s21 = sshra.s32 %s258_s27, 4  ;;  %s540_s4 = scalar_lea.hbm %s771_s2, 16  ;;  %s535_s21 = int_to_ptr.hbm [resolvable:$true] %s534_s21 }
  0x2c   : > { %v233_v5 = vsel %vm232_vm1, %v229_v4, %v379_v2  ;;  %s536_s28 = scalar_lea.hbm %s535_s21, 8  ;;  %p541_p7 = scmp.lt.s32.totalorder %s535_s21, %s771_s2 }
  0x2d   : > { %v237_v6 = vsel %vm236_vm2, %v233_v5, %v380_v3  ;;  %p537_p4 = scmp.ne.s32.totalorder %s535_s21, %s536_s28  ;;  %p542_p8 = scmp.lt.s32.totalorder %s540_s4, %s536_s28 }
  0x2e   : > { %238 = vst [vmem:[%s225_s26] sm:$0xff] %v237_v6 }
  0x2f   : > { %p538_p5 = pnand %p537_p4, %p676_p9  ;;  %p543_p10 = por %p542_p8, %p541_p7 }
  0x31   : > { %p539_p6 = pneg %p538_p5 }
  0x33   : > { %p544_p13 = pnand %p543_p10, %p539_p6 }
  0x35   : > { %547 = shalt.err (!%p544_p13)
}
  0x36   : > { %395 = dma.vmem_to_hbm [thread:$0]  (%p676_p9), %s256_s19, 128, %s258_s27, %s240_s12  }
  0x37 PF: > { %s269_s3 = sand.u32 1, %s586_s9   ;;  %p405_p0 = pnand %p371_p12, %p683_p11 }
  0x38   : > { %s270_s25 = scalar_lea.sflag [#allocation4], %s269_s3 }
  0x39   : > { %p406_p1 = pneg %p405_p0 }
  0x3b   : > { %581 = dma.done.wait (%p406_p1), %s270_s25, 128  }
  0x3c   : > { %583 = vsyncadd (%p406_p1), %s270_s25, 4294967168  ;;  %s21_s14 = sadd.s32 1, %s606_s14   ;;  %s777_s9 = smov %s590_s10 }
  0x3d   : > { %p18_p2 = scmp.ge.s32.totalorder %s21_s14, 4   ;;  %s778_s10 = smov %s594_s11 }
  0x3e   : > { %s779_s11 = smov %s681_s23  ;;  %s780_s12 = smov %s602_s13 }
  0x3f   : > { %s781_s13 = smov %s783_s17  ;;  %20 = sbr.rel (!%p18_p2) target bundleno = 8 (0x8), region = 88 }
  0x44   :  { %276 = vsyncpa [#allocation3], 1 }
  0x45   :  { %278 = vsyncpa [#allocation3 + $0x1], 1 }
  0x46   :  { %279 = vsyncpa [#allocation6], 1 }
  0x47   :  { %281 = vsyncpa [#allocation6 + $0x1], 1 }
  0x48   :  { %282 = vsyncpa [#allocation4], 1 }
  0x49   :  { %284 = vsyncpa [#allocation4 + $0x1], 1 }

</bundles_post_ra>
